<compile_context>
chip_gen: v6e
topology: v6e:2x2x1
jax: 0.10.0
libtpu: 0.0.40
codegen_flags: <defaults>
</compile_context>

<pallas_src>
import functools

import jax
import jax.numpy as jnp
from jax.experimental import pallas as pl
from jax.experimental.pallas import tpu as pltpu


def _sobel_kernel(idx_ref, x_ref, o_ref, *, h, w, hw_pad, scale, compute_dtype):
    """idx_ref: (2, HWp) int32 — row 0 = column index, row 1 = row index of
    every flattened pixel (values past H*W are don't-care padding).
    x_ref / o_ref: (TB, HWp) blocks; each row is one full (H, W) image padded
    to a 128-lane multiple."""
    x = x_ref[...].astype(compute_dtype)            # (TB, HWp)

    col = idx_ref[0:1, :]                           # (1, HWp) int32
    row = idx_ref[1:2, :]
    first_col = col == 0                             # (1, HWp) bool masks
    last_col = col == (w - 1)
    first_row = row == 0
    last_row = row == (h - 1)

    # ---- vertical neighbours: XLU lane-roll by +/-W, replicate fix-up at the
    # top/bottom image rows via the (1, HWp) row masks. ----
    if h > 1:
        up = jnp.where(first_row, x, pltpu.roll(x, w, axis=1))
        dn = jnp.where(last_row, x, pltpu.roll(x, hw_pad - w, axis=1))
    else:
        up = x
        dn = x

    s = up + 2.0 * x + dn        # vertical smooth [1, 2, 1]
    d = dn - up                  # vertical diff   [-1, 0, 1]

    # ---- horizontal neighbours: lane-roll by +/-1, replicate fix-up at the
    # first/last image columns via the (1, HWp) column masks. ----
    if w > 1:
        left_s = jnp.where(first_col, s, pltpu.roll(s, 1, axis=1))
        right_s = jnp.where(last_col, s, pltpu.roll(s, hw_pad - 1, axis=1))
        left_d = jnp.where(first_col, d, pltpu.roll(d, 1, axis=1))
        right_d = jnp.where(last_col, d, pltpu.roll(d, hw_pad - 1, axis=1))
    else:
        left_s = right_s = s
        left_d = right_d = d

    # f32 only for the square/sqrt/scale tail.
    gx = (right_s - left_s).astype(jnp.float32)
    gy = (left_d + 2.0 * d + right_d).astype(jnp.float32)

    mag = jnp.sqrt(gx * gx + gy * gy) * scale
    o_ref[...] = mag.astype(o_ref.dtype)


def _pick_block(n, hw_pad, itemsize, target_bytes=1 << 20):
    """Images per grid step: ~1 MiB of input per DMA (fits v7x's 64 MiB VMEM
    comfortably with f32 intermediates), multiple of 8 sublanes, and — when
    the batch allows it — at least 4 grid steps so the v7x megacore gets >= 2
    steps per TensorCore to overlap DMA with compute."""
    row_bytes = max(hw_pad * itemsize, 1)
    tb = max(8, ((target_bytes // row_bytes) // 8) * 8)
    # TODO(synk): a single huge image (8 * H*W * 4 bytes > VMEM) would need 2D
    # spatial tiling with halo handling; this layout keeps whole images per row.
    if n >= 32:
        quarter = ((n // 4) // 8) * 8
        if quarter >= 8:
            tb = min(tb, quarter)
    if tb >= n:
        return n
    return tb


def _bf16_compute_ok():
    """bf16 VPU math only on v6e/v7x; v5e/v5p would pay convert traffic."""
    try:
        kind = jax.devices()[0].device_kind.lower()
    except Exception:
        return True
    return "v5" not in kind


@functools.partial(jax.jit, static_argnames=("normalized",))
def sobel(x, normalized: bool = True):
    """x: (B, C, H, W) -> (B, C, H, W) Sobel gradient magnitude."""
    b, c, h, w = x.shape
    n, hw = b * c, h * w
    # normalize_kernel2d: divide by the L1 norm of the 3x3 Sobel kernel (= 8).
    scale = (1.0 / 8.0) if normalized else 1.0

    compute_dtype = (jnp.bfloat16
                     if (x.dtype == jnp.bfloat16 and _bf16_compute_ok())
                     else jnp.float32)

    # Lane-dense slab: one image per row, flattened pixel axis padded to a
    # multiple of 128 lanes (unmasked full-vreg loads/stores + aligned rolls).
    hw_pad = ((hw + 127) // 128) * 128
    xf = x.reshape(n, hw)
    if hw_pad != hw:
        xf = jnp.pad(xf, ((0, 0), (0, hw_pad - hw)))

    pix = jnp.arange(hw_pad, dtype=jnp.int32)
    idx = jnp.stack([pix % w, pix // w], axis=0)    # (2, HWp): col ids, row ids

    itemsize = jnp.dtype(x.dtype).itemsize
    tb = _pick_block(n, hw_pad, itemsize)
    grid = (pl.cdiv(n, tb),)

    # VMEM budget: 2x double-buffered input + 2x output + ~12 block-sized f32
    # intermediates (rolled neighbours, s/d, gx/gy, mag) + the tiny id block.
    blk_io = tb * hw_pad * itemsize
    blk_f32 = tb * hw_pad * 4
    vmem_needed = 4 * blk_io + 12 * blk_f32 + 4 * (2 * hw_pad * 4)
    vmem_limit = int(min(max(vmem_needed, 32 * 1024 * 1024), 60 * 1024 * 1024))

    out = pl.pallas_call(
        functools.partial(_sobel_kernel, h=h, w=w, hw_pad=hw_pad, scale=scale,
                          compute_dtype=compute_dtype),
        out_shape=jax.ShapeDtypeStruct((n, hw_pad), x.dtype),
        grid=grid,
        in_specs=[
            pl.BlockSpec((2, hw_pad), lambda i: (0, 0)),   # col/row index rows
            pl.BlockSpec((tb, hw_pad), lambda i: (i, 0)),  # batched image block
        ],
        out_specs=pl.BlockSpec((tb, hw_pad), lambda i: (i, 0)),
        compiler_params=pltpu.CompilerParams(
            dimension_semantics=("parallel",),
            vmem_limit_bytes=vmem_limit),
    )(idx, xf)

    if hw_pad != hw:
        out = out[:, :hw]
    return out.reshape(b, c, h, w)


# Sobel x kernel (cross-correlation form, matching F.conv3d in kornia).
_KX = ((-1.0, 0.0, 1.0),
       (-2.0, 0.0, 2.0),
       (-1.0, 0.0, 1.0))


def _sobel_ref(x, normalized: bool = True):
    """Pure-JAX reference for the correctness check."""
    b, c, h, w = x.shape
    scale = (1.0 / 8.0) if normalized else 1.0
    xp = jnp.pad(x.reshape(b * c, h, w), ((0, 0), (1, 1), (1, 1)), mode="edge")
    kx = jnp.array(_KX, jnp.float32) * scale
    ky = kx.T
    gx = jnp.zeros((b * c, h, w), jnp.float32)
    gy = jnp.zeros((b * c, h, w), jnp.float32)
    for di in range(3):
        for dj in range(3):
            win = xp[:, di:di + h, dj:dj + w].astype(jnp.float32)
            gx = gx + kx[di, dj] * win
            gy = gy + ky[di, dj] * win
    return jnp.sqrt(gx * gx + gy * gy).reshape(b, c, h, w).astype(x.dtype)


if __name__ == "__main__":
    key = jax.random.PRNGKey(0)
    x = jax.random.uniform(key, (2, 4, 16, 16), dtype=jnp.float32)

    out = jax.block_until_ready(sobel(x, normalized=True))

    ref = _sobel_ref(x, normalized=True)
    assert out.shape == (2, 4, 16, 16)
    assert jnp.allclose(out, ref, atol=1e-5, rtol=1e-5)

    print("KERNEL_OK")
</pallas_src>

<mosaic_0001>
module attributes {stable_mosaic.version = 11 : i64} {
  func.func @_sobel_kernel(%arg0: i32, %arg1: memref<2x256xi32, #tpu.memory_space<vmem>>, %arg2: memref<8x256xf32, #tpu.memory_space<vmem>>, %arg3: memref<8x256xf32, #tpu.memory_space<vmem>>) attributes {dimension_semantics = [#tpu.dimension_semantics<parallel>], iteration_bounds = array<i64: 1>, scalar_prefetch = 0 : i64, scratch_operands = 0 : i64, tpu.core_type = #tpu.core_type<tc>, window_params = [{pipeline_mode = #tpu.pipeline_mode<synchronous>, transform_indices = @transform_0, window_bounds = array<i64: 2, 256>}, {transform_indices = @transform_1, window_bounds = array<i64: 8, 256>}, {transform_indices = @transform_2, window_bounds = array<i64: 8, 256>}]} {
    %c0 = arith.constant 0 : index
    %c0_0 = arith.constant 0 : index
    %0 = vector.load %arg2[%c0, %c0_0] : memref<8x256xf32, #tpu.memory_space<vmem>>, vector<8x256xf32>
    %c0_1 = arith.constant 0 : index
    %c0_2 = arith.constant 0 : index
    %1 = vector.load %arg1[%c0_1, %c0_2] : memref<2x256xi32, #tpu.memory_space<vmem>>, vector<1x256xi32>
    %c1 = arith.constant 1 : index
    %c0_3 = arith.constant 0 : index
    %2 = vector.load %arg1[%c1, %c0_3] : memref<2x256xi32, #tpu.memory_space<vmem>>, vector<1x256xi32>
    %c0_i32 = arith.constant 0 : i32
    %3 = vector.broadcast %c0_i32 : i32 to vector<1x256xi32>
    %4 = arith.cmpi eq, %1, %3 : vector<1x256xi32>
    %c15_i32 = arith.constant 15 : i32
    %5 = vector.broadcast %c15_i32 : i32 to vector<1x256xi32>
    %6 = arith.cmpi eq, %1, %5 : vector<1x256xi32>
    %c0_i32_4 = arith.constant 0 : i32
    %7 = vector.broadcast %c0_i32_4 : i32 to vector<1x256xi32>
    %8 = arith.cmpi eq, %2, %7 : vector<1x256xi32>
    %c15_i32_5 = arith.constant 15 : i32
    %9 = vector.broadcast %c15_i32_5 : i32 to vector<1x256xi32>
    %10 = arith.cmpi eq, %2, %9 : vector<1x256xi32>
    %c16_i32 = arith.constant 16 : i32
    %11 = tpu.dynamic_rotate %0 by %c16_i32 dim 1 : vector<8x256xf32>, i32 -> vector<8x256xf32>
    %12 = vector.shape_cast %8 : vector<1x256xi1> to vector<1x256xi1>
    %13 = vector.broadcast %12 : vector<1x256xi1> to vector<8x256xi1>
    %14 = arith.select %13, %0, %11 : vector<8x256xi1>, vector<8x256xf32>
    %c240_i32 = arith.constant 240 : i32
    %15 = tpu.dynamic_rotate %0 by %c240_i32 dim 1 : vector<8x256xf32>, i32 -> vector<8x256xf32>
    %16 = vector.shape_cast %10 : vector<1x256xi1> to vector<1x256xi1>
    %17 = vector.broadcast %16 : vector<1x256xi1> to vector<8x256xi1>
    %18 = arith.select %17, %0, %15 : vector<8x256xi1>, vector<8x256xf32>
    %cst = arith.constant 2.000000e+00 : f32
    %19 = vector.broadcast %cst : f32 to vector<8x256xf32>
    %20 = arith.mulf %19, %0 : vector<8x256xf32>
    %21 = arith.addf %14, %20 : vector<8x256xf32>
    %22 = arith.addf %21, %18 : vector<8x256xf32>
    %23 = arith.subf %18, %14 : vector<8x256xf32>
    %c1_i32 = arith.constant 1 : i32
    %24 = tpu.dynamic_rotate %22 by %c1_i32 dim 1 : vector<8x256xf32>, i32 -> vector<8x256xf32>
    %25 = vector.shape_cast %4 : vector<1x256xi1> to vector<1x256xi1>
    %26 = vector.broadcast %25 : vector<1x256xi1> to vector<8x256xi1>
    %27 = arith.select %26, %22, %24 : vector<8x256xi1>, vector<8x256xf32>
    %c255_i32 = arith.constant 255 : i32
    %28 = tpu.dynamic_rotate %22 by %c255_i32 dim 1 : vector<8x256xf32>, i32 -> vector<8x256xf32>
    %29 = vector.shape_cast %6 : vector<1x256xi1> to vector<1x256xi1>
    %30 = vector.broadcast %29 : vector<1x256xi1> to vector<8x256xi1>
    %31 = arith.select %30, %22, %28 : vector<8x256xi1>, vector<8x256xf32>
    %c1_i32_6 = arith.constant 1 : i32
    %32 = tpu.dynamic_rotate %23 by %c1_i32_6 dim 1 : vector<8x256xf32>, i32 -> vector<8x256xf32>
    %33 = vector.shape_cast %4 : vector<1x256xi1> to vector<1x256xi1>
    %34 = vector.broadcast %33 : vector<1x256xi1> to vector<8x256xi1>
    %35 = arith.select %34, %23, %32 : vector<8x256xi1>, vector<8x256xf32>
    %c255_i32_7 = arith.constant 255 : i32
    %36 = tpu.dynamic_rotate %23 by %c255_i32_7 dim 1 : vector<8x256xf32>, i32 -> vector<8x256xf32>
    %37 = vector.shape_cast %6 : vector<1x256xi1> to vector<1x256xi1>
    %38 = vector.broadcast %37 : vector<1x256xi1> to vector<8x256xi1>
    %39 = arith.select %38, %23, %36 : vector<8x256xi1>, vector<8x256xf32>
    %40 = arith.subf %31, %27 : vector<8x256xf32>
    %cst_8 = arith.constant 2.000000e+00 : f32
    %41 = vector.broadcast %cst_8 : f32 to vector<8x256xf32>
    %42 = arith.mulf %41, %23 : vector<8x256xf32>
    %43 = arith.addf %35, %42 : vector<8x256xf32>
    %44 = arith.addf %43, %39 : vector<8x256xf32>
    %45 = arith.mulf %40, %40 : vector<8x256xf32>
    %46 = arith.mulf %44, %44 : vector<8x256xf32>
    %47 = arith.addf %45, %46 : vector<8x256xf32>
    %48 = math.sqrt %47 : vector<8x256xf32>
    %cst_9 = arith.constant 1.250000e-01 : f32
    %49 = vector.broadcast %cst_9 : f32 to vector<8x256xf32>
    %50 = arith.mulf %48, %49 : vector<8x256xf32>
    %c0_10 = arith.constant 0 : index
    %c0_11 = arith.constant 0 : index
    %51 = vector.load %arg3[%c0_10, %c0_11] : memref<8x256xf32, #tpu.memory_space<vmem>>, vector<8x256xf32>
    tpu.vector_store %arg3[%c0_10, %c0_11], %50 {strides = array<i32>} : memref<8x256xf32, #tpu.memory_space<vmem>>, vector<8x256xf32>,
    return
  }
  func.func @transform_0(%arg0: i32) -> (i32, i32) {
    %c0_i32 = arith.constant 0 : i32
    %c0_i32_0 = arith.constant 0 : i32
    %c0_i32_1 = arith.constant 0 : i32
    return %c0_i32, %c0_i32_0 : i32, i32
  }
  func.func @transform_1(%arg0: i32) -> (i32, i32) {
    %c0_i32 = arith.constant 0 : i32
    %c0_i32_0 = arith.constant 0 : i32
    return %arg0, %c0_i32 : i32, i32
  }
  func.func @transform_2(%arg0: i32) -> (i32, i32) {
    %c0_i32 = arith.constant 0 : i32
    %c0_i32_0 = arith.constant 0 : i32
    return %arg0, %c0_i32 : i32, i32
  }
}

</mosaic_0001>

<bundles_post_ra>
// kernel: sobel.1
= control target key start
LH: loop header
LB: loop body
LE: loop exit
PB: predicated region body
PF: predicated region fallthrough
CT: control target
= control target key end

     0   :  { %s172_s11 = smov 112   ;;  %s173_s12 = smov 16   ;;  %v24_v2 = vlaneseq  ;;  %v174_v7 = vmov 0   ;;  %s276_s1 = inlined_call_operand.vmem [shape: f32[8,256], index: 1, kind: input, shape index: {}]   ;;  %s277_s0 = inlined_call_operand.vmem [shape: s32[2,256], index: 0, kind: input, shape index: {}]   ;;  %s278_s2 = inlined_call_operand.vmem [shape: f32[8,256], index: 2, kind: output, shape index: {}]  }
   0x1   :  { %v11_v0 = vld [vmem:[%s276_s1] sm:$0xff]  ;;  %v12_v1 = vld [vmem:[%s276_s1 + $0x8] sm:$0xff]  ;;  %s175_s1 = smov 1   ;;  %s176_s17 = smov 127  }
   0x2   :  { %42 = vrot.lane.b32.xlu1 %v11_v0, %s172_s11  ;;  %20 = vrot.lane.b32.xlu0 %v11_v0, %s173_s12  ;;  %v162_v3 = vld [vmem:[%s277_s0 + $0x1] ss:$2 sm:$0x3]  ;;  %v31_v4 = vshrl.u32 %v24_v2, 7  ;;  %v205_v10 = vand.u32 127, %v24_v2  ;;  %v63_v17 = vmul.f32 2.0, %v12_v1 }
   0x3   :  { %vm19_vm0 = vcmp.eq.s32.totalorder %v162_v3, 15  ;;  %vm18_vm1 = vcmp.eq.s32.totalorder %v162_v3, 0  ;;  %v62_v18 = vmul.f32 2.0, %v11_v0  ;;  %v13_v35 = vld [vmem:[%s277_s0] ss:$2 sm:$0x3] }
   0x4   :  { %v201_v5 = vsub.s32 0, %v31_v4  ;;  %v203_v6 = vsub.s32 1, %v31_v4  ;;  %v49_v8 = vsel %vm19_vm0, 1, %v174_v7  ;;  %v29_v9 = vsel %vm18_vm1, 1, %v174_v7 }
   0x5   :  { %vm46_vm2 = vcmp.lt.s32.totalorder %v205_v10, 112  ;;  %vm26_vm3 = vcmp.lt.s32.totalorder %v205_v10, 16  ;;  %vm16_vm8 = vcmp.eq.s32.totalorder %v13_v35, 0  ;;  %vm17_vm9 = vcmp.eq.s32.totalorder %v13_v35, 15 }
   0x6   :  { %44 = vrot.lane.b32.xlu1 %v12_v1, %s172_s11  ;;  %22 = vrot.lane.b32.xlu0 %v12_v1, %s173_s12  ;;  %v53_v11 = vrot.slane %v49_v8, %v201_v5  ;;  %v57_v12 = vrot.slane %v49_v8, %v203_v6  ;;  %v33_v13 = vrot.slane %v29_v9, %v201_v5  ;;  %v77_v36 = vsel %vm16_vm8, 1, %v174_v7 }
   0x7   :  { %v37_v14 = vrot.slane %v29_v9, %v203_v6  ;;  %v97_v39 = vsel %vm17_vm9, 1, %v174_v7  ;;  %v81_v40 = vrot.slane %v77_v36, %v201_v5  ;;  %v85_v41 = vrot.slane %v77_v36, %v203_v6 }
   0x8   :  { %vm58_vm4 = vcmp.eq.s32.totalorder %v53_v11, 1  ;;  %vm59_vm5 = vcmp.eq.s32.totalorder %v57_v12, 1  ;;  %vm38_vm6 = vcmp.eq.s32.totalorder %v33_v13, 1  ;;  %vm74_vm10 = vcmp.lt.s32.totalorder %v205_v10, 1 }
   0x9   :  { %vm39_vm7 = vcmp.eq.s32.totalorder %v37_v14, 1  ;;  %v101_v42 = vrot.slane %v97_v39, %v201_v5  ;;  %v105_v43 = vrot.slane %v97_v39, %v203_v6  ;;  %vm221_vm11 = vcmp.eq.s32.totalorder %v81_v40, 1 }
   0xa   :  { %vm225_vm12 = vcmp.eq.s32.totalorder %v85_v41, 1  ;;  %vm94_vm13 = vcmp.lt.s32.totalorder %v205_v10, 127 }
   0xb   :  { %vm234_vm14 = vcmp.eq.s32.totalorder %v101_v42, 1  ;;  %vm238_vm15 = vcmp.eq.s32.totalorder %v105_v43, 1 }
  0x74   :  { %v43_v15 = vpop.permute.xlu1 %42  ;;  %v21_v16 = vpop.permute.xlu0 %20 }
  0x78   :  { %v45_v19 = vpop.permute.xlu1 %44  ;;  %v23_v20 = vpop.permute.xlu0 %22 }
  0x79   :  { %v47_v21 = vsel %vm46_vm2, %v43_v15, %v45_v19  ;;  %v48_v22 = vsel %vm46_vm2, %v45_v19, %v43_v15  ;;  %v27_v23 = vsel %vm26_vm3, %v21_v16, %v23_v20  ;;  %v28_v24 = vsel %vm26_vm3, %v23_v20, %v21_v16 }
  0x7a   :  { %v60_v25 = vsel %vm58_vm4, %v11_v0, %v47_v21  ;;  %v61_v26 = vsel %vm59_vm5, %v12_v1, %v48_v22  ;;  %v40_v27 = vsel %vm38_vm6, %v11_v0, %v28_v24  ;;  %v41_v28 = vsel %vm39_vm7, %v12_v1, %v27_v23 }
  0x7b   :  { %v64_v29 = vadd.f32 %v62_v18, %v40_v27  ;;  %v65_v30 = vadd.f32 %v63_v17, %v41_v28  ;;  %v68_v31 = vsub.f32 %v60_v25, %v40_v27  ;;  %v69_v32 = vsub.f32 %v61_v26, %v41_v28 }
  0x7d   :  { %112 = vrot.lane.b32.xlu1 %v69_v32, %s175_s1  ;;  %110 = vrot.lane.b32.xlu0 %v68_v31, %s175_s1  ;;  %v66_v33 = vadd.f32 %v64_v29, %v60_v25  ;;  %v67_v34 = vadd.f32 %v65_v30, %v61_v26  ;;  %v129_v60 = vmul.f32 2.0, %v69_v32  ;;  %v128_v61 = vmul.f32 2.0, %v68_v31 }
  0x81   :  { %72 = vrot.lane.b32.xlu1 %v67_v34, %s175_s1  ;;  %70 = vrot.lane.b32.xlu0 %v66_v33, %s175_s1 }
  0x85   :  { %92 = vrot.lane.b32.xlu1 %v67_v34, %s176_s17  ;;  %90 = vrot.lane.b32.xlu0 %v66_v33, %s176_s17 }
  0x89   :  { %120 = vrot.lane.b32.xlu1 %v69_v32, %s176_s17  ;;  %118 = vrot.lane.b32.xlu0 %v68_v31, %s176_s17 }
  0xef   :  { %v113_v37 = vpop.permute.xlu1 %112  ;;  %v111_v38 = vpop.permute.xlu0 %110 }
  0xf0   :  { %v114_v48 = vsel %vm74_vm10, %v111_v38, %v113_v37  ;;  %v115_v49 = vsel %vm74_vm10, %v113_v37, %v111_v38 }
  0xf1   :  { %v116_v52 = vsel %vm221_vm11, %v68_v31, %v115_v49  ;;  %v117_v53 = vsel %vm225_vm12, %v69_v32, %v114_v48 }
  0xf2   :  { %v130_v0 = vadd.f32 %v128_v61, %v116_v52  ;;  %v131_v1 = vadd.f32 %v129_v60, %v117_v53 }
  0xf3   :  { %v73_v44 = vpop.permute.xlu1 %72  ;;  %v71_v45 = vpop.permute.xlu0 %70 }
  0xf4   :  { %v75_v56 = vsel %vm74_vm10, %v71_v45, %v73_v44  ;;  %v76_v57 = vsel %vm74_vm10, %v73_v44, %v71_v45 }
  0xf5   :  { %v88_v2 = vsel %vm221_vm11, %v66_v33, %v76_v57  ;;  %v89_v3 = vsel %vm225_vm12, %v67_v34, %v75_v56 }
  0xf7   :  { %v93_v54 = vpop.permute.xlu1 %92  ;;  %v91_v55 = vpop.permute.xlu0 %90 }
  0xf8   :  { %v95_v58 = vsel %vm94_vm13, %v91_v55, %v93_v54  ;;  %v96_v59 = vsel %vm94_vm13, %v93_v54, %v91_v55 }
  0xf9   :  { %v108_v62 = vsel %vm234_vm14, %v66_v33, %v95_v58  ;;  %v109_v63 = vsel %vm238_vm15, %v67_v34, %v96_v59 }
  0xfa   :  { %v126_v6 = vsub.f32 %v108_v62, %v88_v2  ;;  %v127_v7 = vsub.f32 %v109_v63, %v89_v3 }
  0xfb   :  { %v121_v4 = vpop.permute.xlu1 %120  ;;  %v119_v5 = vpop.permute.xlu0 %118 }
  0xfc   :  { %v122_v8 = vsel %vm94_vm13, %v119_v5, %v121_v4  ;;  %v123_v9 = vsel %vm94_vm13, %v121_v4, %v119_v5  ;;  %v134_v15 = vmul.f32 %v126_v6, %v126_v6  ;;  %v135_v16 = vmul.f32 %v127_v7, %v127_v7 }
  0xfd   :  { %v124_v11 = vsel %vm234_vm14, %v68_v31, %v122_v8  ;;  %v125_v12 = vsel %vm238_vm15, %v69_v32, %v123_v9 }
  0xfe   :  { %v132_v13 = vadd.f32 %v130_v0, %v124_v11  ;;  %v133_v14 = vadd.f32 %v131_v1, %v125_v12 }
 0x100   :  { %v136_v17 = vmul.f32 %v132_v13, %v132_v13  ;;  %v137_v18 = vmul.f32 %v133_v14, %v133_v14 }
 0x102   :  { %v138_v19 = vadd.f32 %v136_v17, %v134_v15  ;;  %v139_v20 = vadd.f32 %v137_v18, %v135_v16 }
 0x104   :  { %168 = vrsqrt.f32 %v138_v19  ;;  %vm142_vm0 = vcmp.eq.f32.partialorder %v138_v19, inf  ;;  %v145_v23 = vand.u32 2147483648, %v138_v19  ;;  %vm144_vm1 = vcmp.eq.f32.partialorder %v138_v19, 0.0 }
 0x105   :  { %170 = vrsqrt.f32 %v139_v20  ;;  %vm149_vm2 = vcmp.eq.f32.partialorder %v139_v20, inf  ;;  %v152_v26 = vand.u32 2147483648, %v139_v20  ;;  %vm151_vm3 = vcmp.eq.f32.partialorder %v139_v20, 0.0 }
 0x111   :  { %v169_v21 = vpop.eup %168 }
 0x112   :  { %v171_v22 = vpop.eup %170  ;;  %v141_v10 = vmul.f32 %v169_v21, %v138_v19 }
 0x113   :  { %v148_v24 = vmul.f32 %v171_v22, %v139_v20 }
 0x114   :  { %v143_v25 = vsel %vm142_vm0, %v138_v19, %v141_v10 }
 0x115   :  { %v146_v27 = vsel %vm144_vm1, %v145_v23, %v143_v25  ;;  %v150_v28 = vsel %vm149_vm2, %v139_v20, %v148_v24 }
 0x116   :  { %v153_v29 = vsel %vm151_vm3, %v152_v26, %v150_v28  ;;  %v154_v30 = vmul.f32 0.125, %v146_v27 }
 0x117   :  { %v155_v31 = vmul.f32 0.125, %v153_v29 }
 0x118   :  { %156 = vst [vmem:[%s278_s2] sm:$0xff] %v154_v30 }
 0x119   :  { %157 = vst [vmem:[%s278_s2 + $0x8] sm:$0xff] %v155_v31 }

</bundles_post_ra>
